<compile_context>
chip_gen: v5e
topology: v5e:2x2
jax: 0.10.0
libtpu: 0.0.40
codegen_flags: <defaults>
</compile_context>

<pallas_src>
import jax
import jax.numpy as jnp
import numpy as np
from jax.experimental import pallas as pl
from jax.experimental.pallas import tpu as pltpu

# ---------------- problem sizes (small, synthetic) ----------------
B, S, H, V = 2, 8, 32, 256          # batch, seq, hidden, vocab
NUM_CLASSES = 2
WORDS_PER_CLASS = 2
L_TOTAL = NUM_CLASSES * WORDS_PER_CLASS
LPAD = 128                          # lane-padded label-word dim
CPAD = 128                          # lane-padded class dim (kernel output)
NEG_BIG = -1e30                     # finite (avoids 0 * inf = NaN in the aggregate matmul)


# ---------------- fused kernel: gather + encoder + extract_logits + verbalizer ----------------
def prompt_cls_kernel(ids_ref, lids_ref, emb_ref, w1p_ref, w2p_ref, agg_ref, out_ref):
    # ids_ref, lids_ref : (B*S,) int32 in SMEM (scalar prefetch)
    # emb_ref           : (V, H)    f32   embedding table, resident in VMEM
    # w1p_ref           : (H+1, H)  bf16  [w1 ; b1]   synthetic per-token encoder
    # w2p_ref           : (H+1, LPAD) bf16 [w2[:, label_words] ; b2 | NEG_BIG pad]  LM head, label words only
    # agg_ref           : (LPAD, CPAD) f32 per-class mean matrix (pad rows are zero)
    # out_ref           : (B, CPAD) f32

    # 1) extract the <mask> token id per example and gather its embedding row (in-kernel gather).
    #    tok_b = sum_s input_ids[b,s] * loss_ids[b,s]  (exactly one loss_id == 1 per example)
    rows = []
    for b in range(B):                                   # B=2, static unroll (scalar SMEM reads)
        tok = ids_ref[b * S] * lids_ref[b * S]
        for s in range(1, S):
            tok = tok + ids_ref[b * S + s] * lids_ref[b * S + s]
        rows.append(emb_ref[pl.ds(tok, 1), :])           # (1, H) f32 dynamic row gather from VMEM
    emb_mask = jnp.concatenate(rows, axis=0).astype(jnp.bfloat16)   # (B, H) bf16 MXU operand

    # 2) PLM stand-in: per-token MLP encoder, applied ONLY to the <mask> rows (token-local encoder).
    w1 = w1p_ref[0:H, :]                                 # (H, H) bf16
    b1 = w1p_ref[H:H + 1, :].astype(jnp.float32)         # (1, H) f32
    h = jax.nn.gelu(
        jnp.dot(emb_mask, w1, preferred_element_type=jnp.float32) + b1)   # (B, H) f32

    # 3) verbalizer.project: LM head restricted to label-word columns (pad columns biased to -1e30).
    w2 = w2p_ref[0:H, :]                                 # (H, LPAD) bf16
    b2 = w2p_ref[H:H + 1, :].astype(jnp.float32)         # (1, LPAD) f32
    lw = jnp.dot(h.astype(jnp.bfloat16), w2,
                 preferred_element_type=jnp.float32) + b2                 # (B, LPAD) f32

    # 4) verbalizer normalize+log: log-softmax over label words (exp(-1e30)==0 -> pads vanish).
    m = jnp.max(lw, axis=-1, keepdims=True)
    shifted = lw - m
    logp = shifted - jnp.log(jnp.sum(jnp.exp(shifted), axis=-1, keepdims=True))

    # 5) verbalizer aggregate: per-class mean over label words -> lane-dense (B, CPAD) store.
    out_ref[...] = jnp.dot(logp, agg_ref[...], preferred_element_type=jnp.float32)


def prompt_cls_call(input_ids_flat, loss_ids_flat, emb_table, w1p, w2p, agg):
    return pl.pallas_call(
        prompt_cls_kernel,
        out_shape=jax.ShapeDtypeStruct((B, CPAD), jnp.float32),
        grid_spec=pltpu.PrefetchScalarGridSpec(
            num_scalar_prefetch=2,
            grid=(1,),
            in_specs=[pl.BlockSpec(memory_space=pltpu.MemorySpace.VMEM)] * 4,
            out_specs=pl.BlockSpec(memory_space=pltpu.MemorySpace.VMEM),
        ),
        compiler_params=pltpu.CompilerParams(dimension_semantics=("arbitrary",)),
    )(input_ids_flat, loss_ids_flat, emb_table, w1p, w2p, agg)


# ---------------- init-time constants (hoisted out of the per-forward path) ----------------
def make_verbalizer_constants(w1, b1, w2, b2, label_words_ids):
    flat_ids = np.asarray(label_words_ids).reshape(-1)                               # (C*L,)
    # encoder weights + bias packed into one operand
    w1p = jnp.concatenate([w1, b1[None, :]], axis=0).astype(jnp.bfloat16)            # (H+1, H)
    # LM head restricted to label-word columns, lane-padded; bias row carries NEG_BIG on pad lanes
    w2_lw = jnp.zeros((H, LPAD), jnp.float32).at[:, :L_TOTAL].set(w2[:, flat_ids])
    b2_lw = jnp.full((1, LPAD), NEG_BIG, jnp.float32).at[0, :L_TOTAL].set(b2[flat_ids])
    w2p = jnp.concatenate([w2_lw, b2_lw], axis=0).astype(jnp.bfloat16)               # (H+1, LPAD)
    # per-class mean aggregation matrix (pad rows/cols are zero)
    agg = np.zeros((LPAD, CPAD), np.float32)
    for c in range(NUM_CLASSES):
        agg[c * WORDS_PER_CLASS:(c + 1) * WORDS_PER_CLASS, c] = 1.0 / WORDS_PER_CLASS
    return w1p, w2p, jnp.asarray(agg)


# ---------------- wrapper: PromptForClassification.forward ----------------
@jax.jit
def prompt_for_classification_forward(consts, emb_table, input_ids, loss_ids):
    w1p, w2p, agg = consts
    out_pad = prompt_cls_call(
        input_ids.reshape(-1).astype(jnp.int32),
        loss_ids.reshape(-1).astype(jnp.int32),
        emb_table, w1p, w2p, agg)
    return out_pad[:, :NUM_CLASSES]                                                  # (B, num_classes)


if __name__ == "__main__":
    key = jax.random.PRNGKey(0)
    k_emb, k_w1, k_b1, k_w2, k_b2, k_ids = jax.random.split(key, 6)

    # deterministic synthetic "pre-trained model" parameters
    # TODO(synk): the real PLM (e.g. BERT) and Template soft-prompt processing are not reproducible
    # without checkpoints; a deterministic per-token MLP encoder + LM head stands in.
    emb_table = jax.random.normal(k_emb, (V, H), jnp.float32) * 0.1
    w1 = jax.random.normal(k_w1, (H, H), jnp.float32) * 0.1
    b1 = jax.random.normal(k_b1, (H,), jnp.float32) * 0.01
    w2 = jax.random.normal(k_w2, (H, V), jnp.float32) * 0.1
    b2 = jax.random.normal(k_b2, (V,), jnp.float32) * 0.01

    # batch: input_ids and loss_ids (exactly one <mask> per example)
    input_ids = jax.random.randint(k_ids, (B, S), 0, V, jnp.int32)
    mask_pos = jnp.array([3, 5], jnp.int32)
    loss_ids = jnp.zeros((B, S), jnp.int32).at[jnp.arange(B), mask_pos].set(1)

    # verbalizer: label word ids per class
    label_words_ids = jnp.array([[5, 17], [42, 99]], jnp.int32)                      # (C, L)

    # batch-independent constants built ONCE (not in the forward path)
    consts = make_verbalizer_constants(w1, b1, w2, b2, label_words_ids)

    out = prompt_for_classification_forward(consts, emb_table, input_ids, loss_ids)
    out = jax.block_until_ready(out)

    # pure-JAX reference (mimics the kernel's bf16-operand / f32-accumulate numerics):
    # extract <mask> token -> encoder -> label-word logits -> log-softmax -> per-class mean
    bf = lambda x: x.astype(jnp.bfloat16).astype(jnp.float32)
    mask_pos_ref = jnp.argmax(loss_ids, axis=-1)
    tok_ref = input_ids[jnp.arange(B), mask_pos_ref]
    emb_mask_ref = bf(emb_table[tok_ref])                                            # (B, H)
    h_ref = jax.nn.gelu(emb_mask_ref @ bf(w1) + bf(b1))
    flat_ids = label_words_ids.reshape(-1)
    lw_ref = bf(h_ref) @ bf(w2[:, flat_ids]) + bf(b2[flat_ids])                      # (B, C*L)
    logp_ref = jax.nn.log_softmax(lw_ref, axis=-1)
    ref = logp_ref.reshape(B, NUM_CLASSES, WORDS_PER_CLASS).mean(-1)                 # (B, C)

    assert out.shape == (B, NUM_CLASSES)
    assert np.allclose(np.asarray(out), np.asarray(ref), atol=2e-3), "mismatch vs reference"
    print("KERNEL_OK")
</pallas_src>

<mosaic_0001>
module attributes {stable_mosaic.version = 11 : i64} {
  func.func @prompt_cls_kernel(%arg0: i32, %arg1: memref<16xi32, #tpu.memory_space<smem>>, %arg2: memref<16xi32, #tpu.memory_space<smem>>, %arg3: memref<256x32xf32, #tpu.memory_space<vmem>>, %arg4: memref<33x32xbf16, #tpu.memory_space<vmem>>, %arg5: memref<33x128xbf16, #tpu.memory_space<vmem>>, %arg6: memref<128x128xf32, #tpu.memory_space<vmem>>, %arg7: memref<2x128xf32, #tpu.memory_space<vmem>>) attributes {dimension_semantics = [#tpu.dimension_semantics<arbitrary>], iteration_bounds = array<i64: 1>, scalar_prefetch = 2 : i64, scratch_operands = 0 : i64, tpu.core_type = #tpu.core_type<tc>, window_params = [{pipeline_mode = #tpu.pipeline_mode<synchronous>, transform_indices = @transform_0, window_bounds = array<i64: 256, 32>}, {pipeline_mode = #tpu.pipeline_mode<synchronous>, transform_indices = @transform_1, window_bounds = array<i64: 33, 32>}, {pipeline_mode = #tpu.pipeline_mode<synchronous>, transform_indices = @transform_2, window_bounds = array<i64: 33, 128>}, {pipeline_mode = #tpu.pipeline_mode<synchronous>, transform_indices = @transform_3, window_bounds = array<i64: 128, 128>}, {pipeline_mode = #tpu.pipeline_mode<synchronous>, transform_indices = @transform_4, window_bounds = array<i64: 2, 128>}]} {
    %c0 = arith.constant 0 : index
    %0 = memref.load %arg1[%c0] : memref<16xi32, #tpu.memory_space<smem>>
    %c0_0 = arith.constant 0 : index
    %1 = memref.load %arg2[%c0_0] : memref<16xi32, #tpu.memory_space<smem>>
    %2 = arith.muli %0, %1 : i32
    %c1 = arith.constant 1 : index
    %3 = memref.load %arg1[%c1] : memref<16xi32, #tpu.memory_space<smem>>
    %c1_1 = arith.constant 1 : index
    %4 = memref.load %arg2[%c1_1] : memref<16xi32, #tpu.memory_space<smem>>
    %5 = arith.muli %3, %4 : i32
    %6 = arith.addi %2, %5 : i32
    %c2 = arith.constant 2 : index
    %7 = memref.load %arg1[%c2] : memref<16xi32, #tpu.memory_space<smem>>
    %c2_2 = arith.constant 2 : index
    %8 = memref.load %arg2[%c2_2] : memref<16xi32, #tpu.memory_space<smem>>
    %9 = arith.muli %7, %8 : i32
    %10 = arith.addi %6, %9 : i32
    %c3 = arith.constant 3 : index
    %11 = memref.load %arg1[%c3] : memref<16xi32, #tpu.memory_space<smem>>
    %c3_3 = arith.constant 3 : index
    %12 = memref.load %arg2[%c3_3] : memref<16xi32, #tpu.memory_space<smem>>
    %13 = arith.muli %11, %12 : i32
    %14 = arith.addi %10, %13 : i32
    %c4 = arith.constant 4 : index
    %15 = memref.load %arg1[%c4] : memref<16xi32, #tpu.memory_space<smem>>
    %c4_4 = arith.constant 4 : index
    %16 = memref.load %arg2[%c4_4] : memref<16xi32, #tpu.memory_space<smem>>
    %17 = arith.muli %15, %16 : i32
    %18 = arith.addi %14, %17 : i32
    %c5 = arith.constant 5 : index
    %19 = memref.load %arg1[%c5] : memref<16xi32, #tpu.memory_space<smem>>
    %c5_5 = arith.constant 5 : index
    %20 = memref.load %arg2[%c5_5] : memref<16xi32, #tpu.memory_space<smem>>
    %21 = arith.muli %19, %20 : i32
    %22 = arith.addi %18, %21 : i32
    %c6 = arith.constant 6 : index
    %23 = memref.load %arg1[%c6] : memref<16xi32, #tpu.memory_space<smem>>
    %c6_6 = arith.constant 6 : index
    %24 = memref.load %arg2[%c6_6] : memref<16xi32, #tpu.memory_space<smem>>
    %25 = arith.muli %23, %24 : i32
    %26 = arith.addi %22, %25 : i32
    %c7 = arith.constant 7 : index
    %27 = memref.load %arg1[%c7] : memref<16xi32, #tpu.memory_space<smem>>
    %c7_7 = arith.constant 7 : index
    %28 = memref.load %arg2[%c7_7] : memref<16xi32, #tpu.memory_space<smem>>
    %29 = arith.muli %27, %28 : i32
    %30 = arith.addi %26, %29 : i32
    %31 = arith.index_cast %30 : i32 to index
    %c0_8 = arith.constant 0 : index
    %32 = vector.load %arg3[%31, %c0_8] : memref<256x32xf32, #tpu.memory_space<vmem>>, vector<1x32xf32>
    %c8 = arith.constant 8 : index
    %33 = memref.load %arg1[%c8] : memref<16xi32, #tpu.memory_space<smem>>
    %c8_9 = arith.constant 8 : index
    %34 = memref.load %arg2[%c8_9] : memref<16xi32, #tpu.memory_space<smem>>
    %35 = arith.muli %33, %34 : i32
    %c9 = arith.constant 9 : index
    %36 = memref.load %arg1[%c9] : memref<16xi32, #tpu.memory_space<smem>>
    %c9_10 = arith.constant 9 : index
    %37 = memref.load %arg2[%c9_10] : memref<16xi32, #tpu.memory_space<smem>>
    %38 = arith.muli %36, %37 : i32
    %39 = arith.addi %35, %38 : i32
    %c10 = arith.constant 10 : index
    %40 = memref.load %arg1[%c10] : memref<16xi32, #tpu.memory_space<smem>>
    %c10_11 = arith.constant 10 : index
    %41 = memref.load %arg2[%c10_11] : memref<16xi32, #tpu.memory_space<smem>>
    %42 = arith.muli %40, %41 : i32
    %43 = arith.addi %39, %42 : i32
    %c11 = arith.constant 11 : index
    %44 = memref.load %arg1[%c11] : memref<16xi32, #tpu.memory_space<smem>>
    %c11_12 = arith.constant 11 : index
    %45 = memref.load %arg2[%c11_12] : memref<16xi32, #tpu.memory_space<smem>>
    %46 = arith.muli %44, %45 : i32
    %47 = arith.addi %43, %46 : i32
    %c12 = arith.constant 12 : index
    %48 = memref.load %arg1[%c12] : memref<16xi32, #tpu.memory_space<smem>>
    %c12_13 = arith.constant 12 : index
    %49 = memref.load %arg2[%c12_13] : memref<16xi32, #tpu.memory_space<smem>>
    %50 = arith.muli %48, %49 : i32
    %51 = arith.addi %47, %50 : i32
    %c13 = arith.constant 13 : index
    %52 = memref.load %arg1[%c13] : memref<16xi32, #tpu.memory_space<smem>>
    %c13_14 = arith.constant 13 : index
    %53 = memref.load %arg2[%c13_14] : memref<16xi32, #tpu.memory_space<smem>>
    %54 = arith.muli %52, %53 : i32
    %55 = arith.addi %51, %54 : i32
    %c14 = arith.constant 14 : index
    %56 = memref.load %arg1[%c14] : memref<16xi32, #tpu.memory_space<smem>>
    %c14_15 = arith.constant 14 : index
    %57 = memref.load %arg2[%c14_15] : memref<16xi32, #tpu.memory_space<smem>>
    %58 = arith.muli %56, %57 : i32
    %59 = arith.addi %55, %58 : i32
    %c15 = arith.constant 15 : index
    %60 = memref.load %arg1[%c15] : memref<16xi32, #tpu.memory_space<smem>>
    %c15_16 = arith.constant 15 : index
    %61 = memref.load %arg2[%c15_16] : memref<16xi32, #tpu.memory_space<smem>>
    %62 = arith.muli %60, %61 : i32
    %63 = arith.addi %59, %62 : i32
    %64 = arith.index_cast %63 : i32 to index
    %c0_17 = arith.constant 0 : index
    %65 = vector.load %arg3[%64, %c0_17] : memref<256x32xf32, #tpu.memory_space<vmem>>, vector<1x32xf32>
    %66 = tpu.concatenate %32, %65 in 0 : vector<1x32xf32>, vector<1x32xf32> -> vector<2x32xf32>
    %67 = arith.truncf %66 : vector<2x32xf32> to vector<2x32xbf16>
    %c0_18 = arith.constant 0 : index
    %c0_19 = arith.constant 0 : index
    %68 = vector.load %arg4[%c0_18, %c0_19] : memref<33x32xbf16, #tpu.memory_space<vmem>>, vector<32x32xbf16>
    %c32 = arith.constant 32 : index
    %c0_20 = arith.constant 0 : index
    %69 = vector.load %arg4[%c32, %c0_20] : memref<33x32xbf16, #tpu.memory_space<vmem>>, vector<1x32xbf16>
    %70 = arith.extf %69 : vector<1x32xbf16> to vector<1x32xf32>
    %cst = arith.constant dense<0.000000e+00> : vector<2x32xf32>
    %71 = tpu.matmul %67, %68, %cst {dimension_numbers = #tpu.dot_dimension_numbers<[1], [0], [0], [1], [0, 0, 1, 1], [], []>} : vector<2x32xbf16>, vector<32x32xbf16>, vector<2x32xf32> -> vector<2x32xf32>
    %72 = vector.broadcast %70 : vector<1x32xf32> to vector<2x32xf32>
    %73 = arith.addf %71, %72 : vector<2x32xf32>
    %74 = arith.mulf %73, %73 : vector<2x32xf32>
    %75 = arith.mulf %73, %74 : vector<2x32xf32>
    %cst_21 = arith.constant 4.471500e-02 : f32
    %76 = vector.broadcast %cst_21 : f32 to vector<2x32xf32>
    %77 = arith.mulf %76, %75 : vector<2x32xf32>
    %78 = arith.addf %73, %77 : vector<2x32xf32>
    %cst_22 = arith.constant 0.797884583 : f32
    %79 = vector.broadcast %cst_22 : f32 to vector<2x32xf32>
    %80 = arith.mulf %79, %78 : vector<2x32xf32>
    %81 = math.tanh %80 : vector<2x32xf32>
    %cst_23 = arith.constant 1.000000e+00 : f32
    %82 = vector.broadcast %cst_23 : f32 to vector<2x32xf32>
    %83 = arith.addf %82, %81 : vector<2x32xf32>
    %cst_24 = arith.constant 5.000000e-01 : f32
    %84 = vector.broadcast %cst_24 : f32 to vector<2x32xf32>
    %85 = arith.mulf %84, %83 : vector<2x32xf32>
    %86 = arith.mulf %73, %85 : vector<2x32xf32>
    %c0_25 = arith.constant 0 : index
    %c0_26 = arith.constant 0 : index
    %87 = vector.load %arg5[%c0_25, %c0_26] : memref<33x128xbf16, #tpu.memory_space<vmem>>, vector<32x128xbf16>
    %c32_27 = arith.constant 32 : index
    %c0_28 = arith.constant 0 : index
    %88 = vector.load %arg5[%c32_27, %c0_28] : memref<33x128xbf16, #tpu.memory_space<vmem>>, vector<1x128xbf16>
    %89 = arith.extf %88 : vector<1x128xbf16> to vector<1x128xf32>
    %90 = arith.truncf %86 : vector<2x32xf32> to vector<2x32xbf16>
    %cst_29 = arith.constant dense<0.000000e+00> : vector<2x128xf32>
    %91 = tpu.matmul %90, %87, %cst_29 {dimension_numbers = #tpu.dot_dimension_numbers<[1], [0], [0], [1], [0, 0, 1, 1], [], []>} : vector<2x32xbf16>, vector<32x128xbf16>, vector<2x128xf32> -> vector<2x128xf32>
    %92 = vector.broadcast %89 : vector<1x128xf32> to vector<2x128xf32>
    %93 = arith.addf %91, %92 : vector<2x128xf32>
    %cst_30 = arith.constant dense<0xFF800000> : vector<2xf32>
    %94 = vector.multi_reduction <maximumf>, %93, %cst_30 [1] : vector<2x128xf32> to vector<2xf32>
    %95 = vector.shape_cast %94 : vector<2xf32> to vector<2x1xf32>
    %96 = vector.broadcast %95 : vector<2x1xf32> to vector<2x128xf32>
    %97 = arith.subf %93, %96 : vector<2x128xf32>
    %98 = math.exp %97 : vector<2x128xf32>
    %cst_31 = arith.constant dense<0.000000e+00> : vector<2xf32>
    %99 = vector.multi_reduction <add>, %98, %cst_31 [1] : vector<2x128xf32> to vector<2xf32>
    %100 = vector.shape_cast %99 : vector<2xf32> to vector<2x1xf32>
    %101 = math.log %100 : vector<2x1xf32>
    %102 = vector.broadcast %101 : vector<2x1xf32> to vector<2x128xf32>
    %103 = arith.subf %97, %102 : vector<2x128xf32>
    %c0_32 = arith.constant 0 : index
    %c0_33 = arith.constant 0 : index
    %104 = vector.load %arg6[%c0_32, %c0_33] : memref<128x128xf32, #tpu.memory_space<vmem>>, vector<128x128xf32>
    %cst_34 = arith.constant dense<0.000000e+00> : vector<2x128xf32>
    %105 = tpu.matmul %103, %104, %cst_34 {dimension_numbers = #tpu.dot_dimension_numbers<[1], [0], [0], [1], [0, 0, 1, 1], [], []>} : vector<2x128xf32>, vector<128x128xf32>, vector<2x128xf32> -> vector<2x128xf32>
    %c0_35 = arith.constant 0 : index
    %c0_36 = arith.constant 0 : index
    %106 = vector.load %arg7[%c0_35, %c0_36] : memref<2x128xf32, #tpu.memory_space<vmem>>, vector<2x128xf32>
    tpu.vector_store %arg7[%c0_35, %c0_36], %105 {strides = array<i32>} : memref<2x128xf32, #tpu.memory_space<vmem>>, vector<2x128xf32>,
    return
  }
  func.func @transform_0(%arg0: i32, %arg1: memref<16xi32, #tpu.memory_space<smem>>, %arg2: memref<16xi32, #tpu.memory_space<smem>>) -> (i32, i32) {
    %c0_i32 = arith.constant 0 : i32
    %c0_i32_0 = arith.constant 0 : i32
    %c0_i32_1 = arith.constant 0 : i32
    return %c0_i32, %c0_i32_0 : i32, i32
  }
  func.func @transform_1(%arg0: i32, %arg1: memref<16xi32, #tpu.memory_space<smem>>, %arg2: memref<16xi32, #tpu.memory_space<smem>>) -> (i32, i32) {
    %c0_i32 = arith.constant 0 : i32
    %c0_i32_0 = arith.constant 0 : i32
    %c0_i32_1 = arith.constant 0 : i32
    return %c0_i32, %c0_i32_0 : i32, i32
  }
  func.func @transform_2(%arg0: i32, %arg1: memref<16xi32, #tpu.memory_space<smem>>, %arg2: memref<16xi32, #tpu.memory_space<smem>>) -> (i32, i32) {
    %c0_i32 = arith.constant 0 : i32
    %c0_i32_0 = arith.constant 0 : i32
    %c0_i32_1 = arith.constant 0 : i32
    return %c0_i32, %c0_i32_0 : i32, i32
  }
  func.func @transform_3(%arg0: i32, %arg1: memref<16xi32, #tpu.memory_space<smem>>, %arg2: memref<16xi32, #tpu.memory_space<smem>>) -> (i32, i32) {
    %c0_i32 = arith.constant 0 : i32
    %c0_i32_0 = arith.constant 0 : i32
    %c0_i32_1 = arith.constant 0 : i32
    return %c0_i32, %c0_i32_0 : i32, i32
  }
  func.func @transform_4(%arg0: i32, %arg1: memref<16xi32, #tpu.memory_space<smem>>, %arg2: memref<16xi32, #tpu.memory_space<smem>>) -> (i32, i32) {
    %c0_i32 = arith.constant 0 : i32
    %c0_i32_0 = arith.constant 0 : i32
    %c0_i32_1 = arith.constant 0 : i32
    return %c0_i32, %c0_i32_0 : i32, i32
  }
}

</mosaic_0001>

<bundles_post_ra>
// kernel: prompt_for_classification_forward.1
= control target key start
LH: loop header
LB: loop body
LE: loop exit
PB: predicated region body
PF: predicated region fallthrough
CT: control target
= control target key end

     0   :  { %s382_s27 = smov [#allocation3]   ;;  %s383_s28 = smov [#allocation4]   ;;  %s520_s0 = inlined_call_operand.vmem [shape: s32[16], index: 0, kind: input, shape index: {}]   ;;  %s521_s2 = inlined_call_operand.vmem [shape: f32[256,32], index: 2, kind: input, shape index: {}]   ;;  %s522_s3 = inlined_call_operand.vmem [shape: bf16[33,32], index: 3, kind: input, shape index: {}]   ;;  %s523_s4 = inlined_call_operand.vmem [shape: bf16[33,128], index: 4, kind: input, shape index: {}]   ;;  %s524_s5 = inlined_call_operand.vmem [shape: f32[128,128], index: 5, kind: input, shape index: {}]   ;;  %s525_s6 = inlined_call_operand.hbm [shape: f32[2,128], index: 6, kind: output, shape index: {}]   ;;  %s526_s1 = inlined_call_operand.vmem [shape: s32[16], index: 1, kind: input, shape index: {}]  }
   0x1   :  { %531 = sst [smem:[#allocation9_spill]] %s521_s2  ;;  %s12_s23 = sshll.u32 %s520_s0, 4  ;;  %s13_s23 = int_to_ptr.vmem [resolvable:$true] %s12_s23 }
   0x2   :  { %532 = sst [smem:[#allocation10_spill]] %s522_s3  ;;  %s17_s26 = sshll.u32 %s526_s1, 4  ;;  %s18_s26 = int_to_ptr.vmem [resolvable:$true] %s17_s26 }
   0x3   :  { %533 = sst [smem:[#allocation11_spill]] %s523_s4 }
   0x4   :  { %534 = sst [smem:[#allocation12_spill]] %s524_s5 }
   0x5   :  { %535 = sst [smem:[#allocation13_spill]] %s525_s6 }
   0x6   :  { %15 = dma.vmem_to_smem %s13_s23, 16, %s382_s27, [#allocation2] }
   0x7   :  { %20 = dma.vmem_to_smem %s18_s26, 16, %s383_s28, [#allocation2] }
   0x8   :  { %378 = dma.done.wait [#allocation2], 32 }
   0x9   :  { %379 = vsyncadd [#allocation2], 4294967264 }
   0xa   :  { %23 = sfence }
   0xb   :  { %v318_v0 = vld [vmem:[%s522_s3 + $0x8] sm:$0xff] }
   0xc   :  { %24 = vsyncpa [#allocation6], 0  ;;  %s34_s7 = sld [smem:[#allocation3]]  ;;  %135 = vmatpush.bf16.msra.mxu0 %v318_v0  ;;  %v317_v1 = vld [vmem:[%s522_s3] sm:$0xff]  ;;  %vm103_vm0 = vcmask 1040384   ;;  %vm125_vm1 = vcmask 261120  }
   0xd   :  { %s35_s1 = sld [smem:[#allocation4]]  ;;  %vm187_vm2 = vcmask 1041408  }
   0xe   :  { %s269_s9 = sld [smem:[#allocation3 + $0x1]] }
   0xf   :  { %s270_s10 = sld [smem:[#allocation4 + $0x1]] }
  0x10   :  { %136 = vmatpush.bf16.msra.mxu0 %v317_v1  ;;  %s271_s11 = sld [smem:[#allocation3 + $0x2]] }
  0x11   :  { %s272_s12 = sld [smem:[#allocation4 + $0x2]] }
  0x12   :  { %s273_s13 = sld [smem:[#allocation3 + $0x3]] }
  0x13   :  { %s274_s14 = sld [smem:[#allocation4 + $0x3]]  ;;  %s36_s15 = smul.u32 %s35_s1, %s34_s7 }
  0x14   :  { %s275_s17 = sld [smem:[#allocation3 + $0x4]] }
  0x15   :  { %s39_s16 = smul.u32 %s270_s10, %s269_s9  ;;  %s276_s18 = sld [smem:[#allocation4 + $0x4]] }
  0x16   :  { %s432_s20 = sld [smem:[#allocation3 + $0x5]] }
  0x17   :  { %s43_s19 = smul.u32 %s272_s12, %s271_s11  ;;  %s40_s21 = sadd.s32 %s39_s16, %s36_s15 }
  0x18   :  { %s278_s22 = sld [smem:[#allocation4 + $0x5]] }
  0x19   :  { %s434_s23 = sld [smem:[#allocation3 + $0x6]]  ;;  %s47_s24 = smul.u32 %s274_s14, %s273_s13 }
  0x1a   :  { %s436_s25 = sld [smem:[#allocation4 + $0x6]]  ;;  %s44_s26 = sadd.s32 %s43_s19, %s40_s21 }
  0x1b   :  { %s283_s27 = sld [smem:[#allocation3 + $0x8]]  ;;  %s51_s29 = smul.u32 %s276_s18, %s275_s17 }
  0x1c   :  { %s284_s28 = sld [smem:[#allocation4 + $0x8]]  ;;  %s48_s7 = sadd.s32 %s47_s24, %s44_s26 }
  0x1d   :  { %s285_s30 = sld [smem:[#allocation3 + $0x9]]  ;;  %s52_s9 = sadd.s32 %s51_s29, %s48_s7 }
  0x1e   :  { %s286_s0 = sld [smem:[#allocation4 + $0x9]]  ;;  %s55_s13 = smul.u32 %s278_s22, %s432_s20 }
  0x1f   :  { %s287_s8 = sld [smem:[#allocation3 + $0xa]] }
  0x20   :  { %s438_s1 = sld [smem:[#allocation3 + $0x7]]  ;;  %s59_s19 = smul.u32 %s436_s25, %s434_s23 }
  0x21   :  { %s288_s10 = sld [smem:[#allocation4 + $0xa]]  ;;  %s56_s6 = sadd.s32 %s55_s13, %s52_s9 }
  0x22   :  { %s440_s11 = sld [smem:[#allocation4 + $0x7]]  ;;  %s69_s12 = smul.u32 %s284_s28, %s283_s27 }
  0x23   :  { %s289_s14 = sld [smem:[#allocation3 + $0xb]]  ;;  %s60_s2 = sadd.s32 %s59_s19, %s56_s6 }
  0x24   :  { %s72_s15 = smul.u32 %s286_s0, %s285_s30  ;;  %s290_s16 = sld [smem:[#allocation4 + $0xb]] }
  0x25   :  { %s291_s21 = sld [smem:[#allocation3 + $0xc]] }
  0x26   :  { %s73_s17 = sadd.s32 %s72_s15, %s69_s12  ;;  %s292_s18 = sld [smem:[#allocation4 + $0xc]] }
  0x27   :  { %s76_s24 = smul.u32 %s288_s10, %s287_s8  ;;  %s293_s26 = sld [smem:[#allocation3 + $0xd]] }
  0x28   :  { %s294_s5 = sld [smem:[#allocation4 + $0xd]]  ;;  %s63_s28 = smul.u32 %s440_s11, %s438_s1 }
  0x29   :  { %s77_s3 = sadd.s32 %s76_s24, %s73_s17  ;;  %s295_s29 = sld [smem:[#allocation3 + $0xe]] }
  0x2a   :  { %s80_s7 = smul.u32 %s290_s16, %s289_s14  ;;  %s296_s4 = sld [smem:[#allocation4 + $0xe]] }
  0x2b   :  { %s297_s27 = sld [smem:[#allocation3 + $0xf]]  ;;  %s64_s15 = sadd.s32 %s63_s28, %s60_s2 }
  0x2c   :  { %s81_s20 = sadd.s32 %s80_s7, %s77_s3  ;;  %s84_s22 = smul.u32 %s292_s18, %s291_s21 }
  0x2d   :  { %s298_s30 = sld [smem:[#allocation4 + $0xf]] }
  0x2e   :  { %s85_s23 = sadd.s32 %s84_s22, %s81_s20  ;;  %s88_s25 = smul.u32 %s294_s5, %s293_s26 }
  0x2f   :  { %s536_s17 = sld [smem:[#allocation9_spill]]  ;;  %s384_s22 = smov [#allocation5]  }
  0x30   :  { %s89_s0 = sadd.s32 %s88_s25, %s85_s23  ;;  %s92_s12 = smul.u32 %s296_s4, %s295_s29 }
  0x31   :  { %s537_s4 = sld [smem:[#allocation11_spill]]  ;;  %s242_s28 = sshll.u32 %s384_s22, 4  ;;  %s243_s28 = int_to_ptr.vmem [resolvable:$true] %s242_s28 }
  0x32   :  { %s93_s8 = sadd.s32 %s92_s12, %s89_s0  ;;  %s538_s18 = sld [smem:[#allocation10_spill]] }
  0x33   :  { %s96_s10 = smul.u32 %s298_s30, %s297_s27  ;;  %s539_s20 = sld [smem:[#allocation12_spill]] }
  0x34   :  { %s540_s25 = sld [smem:[#allocation13_spill]] }
  0x35   :  { %s65_s24 = scalar_lea.vmem %s536_s17, %s64_s15  ;;  %s97_s14 = sadd.s32 %s96_s10, %s93_s8 }
  0x36   :  { %s98_s19 = scalar_lea.vmem %s536_s17, %s97_s14  ;;  %v66_v2 = vld [vmem:[%s65_s24] sm:$0x1] }
  0x37   :  { %v99_v3 = vld [vmem:[%s98_s19] sm:$0x1]  ;;  %v320_v7 = vld [vmem:[%s537_s4 + $0x8] sm:$0xff]  ;;  %v155_v25 = vld [vmem:[%s537_s4 + $0x10] sm:$0x1] }
  0x38   :  { %v101_v4 = vrot.slane %v99_v3, 7  ;;  %180 = vmatpush.bf16.msra.mxu1 %v320_v7  ;;  %v319_v8 = vld [vmem:[%s537_s4] sm:$0xff]  ;;  %v110_v9 = vld [vmem:[%s538_s18 + $0x10] sm:$0x1]  ;;  %v156_v26 = vunpack.c.l.bf16 %v155_v25 }
  0x39   :  { %v111_v10 = vunpack.c.l.bf16 %v110_v9  ;;  %v215_v32 = vld [vmem:[%s539_s20 + $0x78] sm:$0xff]  ;;  %v214_v33 = vld [vmem:[%s539_s20 + $0x70] sm:$0xff]  ;;  %v213_v34 = vld [vmem:[%s539_s20 + $0x68] sm:$0xff] }
  0x3a   :  { %v104_v5 = vsel %vm103_vm0, %v66_v2, %v101_v4  ;;  %v158_v27 = vperm.slane %v156_v26, 0  ;;  %216 = vmatpush.msra.mxu2 %v215_v32  ;;  %v212_v35 = vld [vmem:[%s539_s20 + $0x60] sm:$0xff]  ;;  %v211_v36 = vld [vmem:[%s539_s20 + $0x58] sm:$0xff]  ;;  %v210_v37 = vld [vmem:[%s539_s20 + $0x50] sm:$0xff]  ;;  %s244_s0 = sshll.u32 %s540_s25, 4  ;;  %s245_s0 = int_to_ptr.hbm [resolvable:$true] %s244_s0 }
  0x3b   :  { %v105_v6 = vpack.c.bf16 %v104_v5, %v104_v5  ;;  %v112_v11 = vperm.slane %v111_v10, 0  ;;  %v209_v38 = vld [vmem:[%s539_s20 + $0x48] sm:$0xff]  ;;  %v208_v39 = vld [vmem:[%s539_s20 + $0x40] sm:$0xff]  ;;  %v207_v40 = vld [vmem:[%s539_s20 + $0x38] sm:$0xff] }
  0x3c   :  { %181 = vmatpush.bf16.msra.mxu1 %v319_v8  ;;  %217 = vmatpush.msra.mxu2 %v214_v33  ;;  %v206_v41 = vld [vmem:[%s539_s20 + $0x30] sm:$0xff]  ;;  %v205_v47 = vld [vmem:[%s539_s20 + $0x28] sm:$0xff]  ;;  %v204_v48 = vld [vmem:[%s539_s20 + $0x20] sm:$0xff] }
  0x3d   :  { %307 = vmatmul.msk.bf16.vlgmr.msra.gmra.mxu0 %vm125_vm1, %v105_v6  ;;  %v203_v49 = vld [vmem:[%s539_s20 + $0x18] sm:$0xff]  ;;  %v202_v50 = vld [vmem:[%s539_s20 + $0x10] sm:$0xff]  ;;  %v201_v51 = vld [vmem:[%s539_s20 + $0x8] sm:$0xff] }
  0x3e   :  { %218 = vmatpush.msra.mxu2 %v213_v34  ;;  %v200_v52 = vld [vmem:[%s539_s20] sm:$0xff] }
  0x40   :  { %219 = vmatpush.msra.mxu2 %v212_v35 }
  0x42   :  { %220 = vmatpush.msra.mxu2 %v211_v36 }
  0x44   :  { %221 = vmatpush.msra.mxu2 %v210_v37 }
  0x46   :  { %222 = vmatpush.msra.mxu2 %v209_v38 }
  0x48   :  { %223 = vmatpush.msra.mxu2 %v208_v39 }
  0x4a   :  { %224 = vmatpush.msra.mxu2 %v207_v40 }
  0x4c   :  { %225 = vmatpush.msra.mxu2 %v206_v41 }
  0x4e   :  { %226 = vmatpush.msra.mxu2 %v205_v47 }
  0x50   :  { %227 = vmatpush.msra.mxu2 %v204_v48 }
  0x52   :  { %228 = vmatpush.msra.mxu2 %v203_v49 }
  0x54   :  { %229 = vmatpush.msra.mxu2 %v202_v50 }
  0x56   :  { %230 = vmatpush.msra.mxu2 %v201_v51 }
  0x58   :  { %231 = vmatpush.msra.mxu2 %v200_v52 }
  0xba   :  { %v138_v12 = vpop.f32.mrf.mxu0 }
  0xbb   :  { %v139_v13 = vadd.f32 %v138_v12, %v112_v11 }
  0xbd   :  { %v142_v14 = vmul.f32 %v139_v13, %v139_v13 }
  0xbf   :  { %v143_v15 = vmul.f32 %v142_v14, %v139_v13 }
  0xc1   :  { %v144_v16 = vmul.f32 0.044715, %v143_v15 }
  0xc2   :  { %v140_v17 = vpop.f32.mrf.mxu0 }
  0xc3   :  { %v145_v18 = vadd.f32 %v144_v16, %v139_v13 }
  0xc5   :  { %v146_v19 = vmul.f32 0.7978846, %v145_v18 }
  0xc7   :  { %324 = vtanh.f32 %v146_v19 }
  0xcd   :  { %v325_v20 = vpop.eup %324 }
  0xce   :  { %v148_v21 = vadd.f32 1.0, %v325_v20 }
  0xd0   :  { %v149_v22 = vmul.f32 0.5, %v148_v21 }
  0xd2   :  { %v150_v23 = vmul.f32 %v149_v22, %v139_v13 }
  0xd4   :  { %v157_v24 = vpack.c.bf16 %v150_v23, %v150_v23 }
  0xd6   :  { %316 = vmatmul.msk.bf16.vlgmr.msra.gmra.mxu1 %vm125_vm1, %v157_v24 }
 0x153   :  { %v183_v28 = vpop.f32.mrf.mxu1 }
 0x154   :  { %v184_v29 = vadd.f32 %v183_v28, %v158_v27 }
 0x156   :  { %v188_v30 = vsel %vm187_vm2, %v184_v29, -inf }
 0x157   :  { %189 = vmax.xlane.f32.xlu0 %v188_v30 }
 0x15b   :  { %v185_v31 = vpop.f32.mrf.mxu1 }
 0x1ca   :  { %v190_v42 = vpop.xlane.xlu0 %189 }
 0x1cb   :  { %v191_v43 = vsub.f32 %v184_v29, %v190_v42 }
 0x1cd   :  { %v192_v44 = vmul.f32 1.442695, %v191_v43 }
 0x1cf   :  { %326 = vpow2.f32 %v192_v44 }
 0x1d5   :  { %v327_v45 = vpop.eup %326 }
 0x1d6   :  { %v194_v46 = vsel %vm187_vm2, %v327_v45, 0.0 }
 0x1d7   :  { %195 = vadd.xlane.f32.xlu0 %v194_v46 }
 0x24a   :  { %v196_v53 = vpop.xlane.xlu0 %195 }
 0x24b   :  { %328 = vlog2.f32 %v196_v53 }
 0x251   :  { %v329_v54 = vpop.eup %328 }
 0x252   :  { %v198_v55 = vmul.f32 0.6931472, %v329_v54 }
 0x254   :  { %v199_v56 = vsub.f32 %v191_v43, %v198_v55 }
 0x256   :  { %232 = vmatmul.f32.vlgmr.msra.gmra.mxu2 %v199_v56 }
 0x2d9   :  { %v233_v57 = vpop.f32.mrf.mxu2 }
 0x2da   :  { %236 = vst [vmem:[#allocation5] sm:$0x3] %v233_v57 }
 0x2db   :  { %247 = dma.vmem_to_hbm [thread:$0]  %s243_s28, 32, %s245_s0, [#allocation6]  }
 0x2dc   :  { %380 = dma.done.wait [#allocation6], 32  }
 0x2dd   :  { %381 = vsyncadd [#allocation6], 4294967264 }
 0x2de   :  { %252 = vsyncpa [#allocation6], 1 }

</bundles_post_ra>
